<compile_context>
chip_gen: v5e
topology: v5e:2x2
jax: 0.10.0
libtpu: 0.0.40
codegen_flags: <defaults>
</compile_context>

<pallas_src>
import jax
import jax.numpy as jnp
from jax.experimental import pallas as pl
from jax.experimental.pallas import tpu as pltpu


def ae2_kernel(x_ref,
               w1_ref, b1_ref,          # encoder L1
               w2_ref, b2_ref,          # encoder L2
               w34_ref, b34_ref,        # fused encoder L3 @ decoder L1
               w5_ref, b5_ref,          # decoder L2
               w6_ref, b6_ref,          # decoder L3 (reconstruction)
               o_ref):
    h = x_ref[...]

    def linear(h, w_ref, b_ref, relu):
        # Feed MXU operands in the weight's stored dtype (f32 no-op, bf16 native),
        # accumulate in f32; keep bias add / ReLU in f32 (v5e has no bf16 VPU).
        y = jnp.dot(h.astype(w_ref.dtype), w_ref[...],
                    preferred_element_type=jnp.float32)
        y = y + b_ref[...].astype(jnp.float32)
        return jnp.maximum(y, 0.0) if relu else y

    h = linear(h, w1_ref, b1_ref, relu=True)      # D_IN -> H1
    h = linear(h, w2_ref, b2_ref, relu=True)      # H1   -> H2
    h = linear(h, w34_ref, b34_ref, relu=True)    # H2   -> H2 (fused L3+L4, ReLU after)
    h = linear(h, w5_ref, b5_ref, relu=True)      # H2   -> H1
    out = linear(h, w6_ref, b6_ref, relu=False)   # H1   -> D_IN

    o_ref[...] = out.astype(o_ref.dtype)


def fuse_params(params):
    """Fuse encoder L3 with decoder L1 (no nonlinearity between them)."""
    (w1, b1), (w2, b2), (w3, b3), (w4, b4), (w5, b5), (w6, b6) = params
    w34 = w3 @ w4                 # (H2, H2)
    b34 = b3 @ w4 + b4            # (1, H2)
    return [(w1, b1), (w2, b2), (w34, b34), (w5, b5), (w6, b6)]


def _choose_block_b(B):
    # Big batch tiles amortize the ~0.35 us per-grid-step overhead; when the
    # batch is large keep grid >= 2 so both v7x TensorCores get work.
    if B < 512:
        return B                  # single grid step; weights/activations fit VMEM trivially
    for tb in (2048, 1024, 512, 256, 128, 64, 32, 16, 8):
        if B % tb == 0 and B // tb >= 2:
            return tb
    return B


def ae2_forward(x, params, *, block_b=None):
    B, d_in = x.shape
    fused = fuse_params(params)
    if block_b is None:
        block_b = _choose_block_b(B)
    assert B % block_b == 0, "batch must be divisible by block_b"

    def full_spec(shape):
        # Constant index map -> array stays resident in VMEM across grid steps.
        return pl.BlockSpec(shape, lambda i: (0, 0))

    in_specs = [pl.BlockSpec((block_b, d_in), lambda i: (i, 0))]
    flat_args = [x]
    for w, b in fused:
        in_specs += [full_spec(w.shape), full_spec(b.shape)]
        flat_args += [w, b]

    out_spec = pl.BlockSpec((block_b, d_in), lambda i: (i, 0))

    return pl.pallas_call(
        ae2_kernel,
        out_shape=jax.ShapeDtypeStruct((B, d_in), x.dtype),
        grid_spec=pltpu.PrefetchScalarGridSpec(
            num_scalar_prefetch=0,
            grid=(B // block_b,),
            in_specs=in_specs,
            out_specs=out_spec,
        ),
        compiler_params=pltpu.CompilerParams(
            dimension_semantics=("parallel",)),
    )(*flat_args)


def init_linear(key, fan_in, fan_out, dtype=jnp.float32):
    # PyTorch-Linear-like uniform init; weight stored pre-transposed as (in, out).
    kw, kb = jax.random.split(key)
    bound = 1.0 / jnp.sqrt(fan_in)
    w = jax.random.uniform(kw, (fan_in, fan_out), dtype, -bound, bound)
    b = jax.random.uniform(kb, (1, fan_out), dtype, -bound, bound)
    return w, b


if __name__ == "__main__":
    # cfg: ae2_input=32, ae2_hidden1=64, ae2_hidden2=32, ae2_output=16
    D_IN, H1, H2, D_OUT = 32, 64, 32, 16
    B = 16

    key = jax.random.PRNGKey(0)
    keys = jax.random.split(key, 7)

    params = [
        init_linear(keys[0], D_IN, H1),    # encoder L1
        init_linear(keys[1], H1, H2),      # encoder L2
        init_linear(keys[2], H2, D_OUT),   # encoder L3 (code)
        init_linear(keys[3], D_OUT, H2),   # decoder L1
        init_linear(keys[4], H2, H1),      # decoder L2
        init_linear(keys[5], H1, D_IN),    # decoder L3 (reconstruction)
    ]

    x = jax.random.normal(keys[6], (B, D_IN), jnp.float32)

    out = ae2_forward(x, params)
    out = jax.block_until_ready(out)

    # Reference check in plain JAX against the *unfused* original chain.
    def ref(x, params):
        h = x
        relus = [True, True, False, True, True, False]
        for (w, b), r in zip(params, relus):
            h = h @ w + b
            if r:
                h = jnp.maximum(h, 0.0)
        return h

    expected = ref(x, params)
    assert out.shape == (B, D_IN)
    # Fusion of L3/L4 reassociates the math -> ~1e-7-level differences in f32.
    assert jnp.allclose(out, expected, atol=1e-4, rtol=1e-4)

    print("KERNEL_OK")
</pallas_src>

<mosaic_0001>
module attributes {stable_mosaic.version = 11 : i64} {
  func.func @ae2_kernel(%arg0: i32, %arg1: memref<16x32xf32, #tpu.memory_space<vmem>>, %arg2: memref<32x64xf32, #tpu.memory_space<vmem>>, %arg3: memref<1x64xf32, #tpu.memory_space<vmem>>, %arg4: memref<64x32xf32, #tpu.memory_space<vmem>>, %arg5: memref<1x32xf32, #tpu.memory_space<vmem>>, %arg6: memref<32x32xf32, #tpu.memory_space<vmem>>, %arg7: memref<1x32xf32, #tpu.memory_space<vmem>>, %arg8: memref<32x64xf32, #tpu.memory_space<vmem>>, %arg9: memref<1x64xf32, #tpu.memory_space<vmem>>, %arg10: memref<64x32xf32, #tpu.memory_space<vmem>>, %arg11: memref<1x32xf32, #tpu.memory_space<vmem>>, %arg12: memref<16x32xf32, #tpu.memory_space<vmem>>) attributes {dimension_semantics = [#tpu.dimension_semantics<parallel>], iteration_bounds = array<i64: 1>, scalar_prefetch = 0 : i64, scratch_operands = 0 : i64, tpu.core_type = #tpu.core_type<tc>, window_params = [{transform_indices = @transform_0, window_bounds = array<i64: 16, 32>}, {pipeline_mode = #tpu.pipeline_mode<synchronous>, transform_indices = @transform_1, window_bounds = array<i64: 32, 64>}, {pipeline_mode = #tpu.pipeline_mode<synchronous>, transform_indices = @transform_2, window_bounds = array<i64: 1, 64>}, {pipeline_mode = #tpu.pipeline_mode<synchronous>, transform_indices = @transform_3, window_bounds = array<i64: 64, 32>}, {pipeline_mode = #tpu.pipeline_mode<synchronous>, transform_indices = @transform_4, window_bounds = array<i64: 1, 32>}, {pipeline_mode = #tpu.pipeline_mode<synchronous>, transform_indices = @transform_5, window_bounds = array<i64: 32, 32>}, {pipeline_mode = #tpu.pipeline_mode<synchronous>, transform_indices = @transform_6, window_bounds = array<i64: 1, 32>}, {pipeline_mode = #tpu.pipeline_mode<synchronous>, transform_indices = @transform_7, window_bounds = array<i64: 32, 64>}, {pipeline_mode = #tpu.pipeline_mode<synchronous>, transform_indices = @transform_8, window_bounds = array<i64: 1, 64>}, {pipeline_mode = #tpu.pipeline_mode<synchronous>, transform_indices = @transform_9, window_bounds = array<i64: 64, 32>}, {pipeline_mode = #tpu.pipeline_mode<synchronous>, transform_indices = @transform_10, window_bounds = array<i64: 1, 32>}, {transform_indices = @transform_11, window_bounds = array<i64: 16, 32>}]} {
    %c0 = arith.constant 0 : index
    %c0_0 = arith.constant 0 : index
    %0 = vector.load %arg1[%c0, %c0_0] : memref<16x32xf32, #tpu.memory_space<vmem>>, vector<16x32xf32>
    %c0_1 = arith.constant 0 : index
    %c0_2 = arith.constant 0 : index
    %1 = vector.load %arg2[%c0_1, %c0_2] : memref<32x64xf32, #tpu.memory_space<vmem>>, vector<32x64xf32>
    %cst = arith.constant dense<0.000000e+00> : vector<16x64xf32>
    %2 = tpu.matmul %0, %1, %cst {dimension_numbers = #tpu.dot_dimension_numbers<[1], [0], [0], [1], [0, 0, 1, 1], [], []>} : vector<16x32xf32>, vector<32x64xf32>, vector<16x64xf32> -> vector<16x64xf32>
    %c0_3 = arith.constant 0 : index
    %c0_4 = arith.constant 0 : index
    %3 = vector.load %arg3[%c0_3, %c0_4] : memref<1x64xf32, #tpu.memory_space<vmem>>, vector<1x64xf32>
    %4 = vector.broadcast %3 : vector<1x64xf32> to vector<16x64xf32>
    %5 = arith.addf %2, %4 : vector<16x64xf32>
    %cst_5 = arith.constant 0.000000e+00 : f32
    %6 = vector.broadcast %cst_5 : f32 to vector<16x64xf32>
    %7 = arith.maximumf %5, %6 : vector<16x64xf32>
    %c0_6 = arith.constant 0 : index
    %c0_7 = arith.constant 0 : index
    %8 = vector.load %arg4[%c0_6, %c0_7] : memref<64x32xf32, #tpu.memory_space<vmem>>, vector<64x32xf32>
    %cst_8 = arith.constant dense<0.000000e+00> : vector<16x32xf32>
    %9 = tpu.matmul %7, %8, %cst_8 {dimension_numbers = #tpu.dot_dimension_numbers<[1], [0], [0], [1], [0, 0, 1, 1], [], []>} : vector<16x64xf32>, vector<64x32xf32>, vector<16x32xf32> -> vector<16x32xf32>
    %c0_9 = arith.constant 0 : index
    %c0_10 = arith.constant 0 : index
    %10 = vector.load %arg5[%c0_9, %c0_10] : memref<1x32xf32, #tpu.memory_space<vmem>>, vector<1x32xf32>
    %11 = vector.broadcast %10 : vector<1x32xf32> to vector<16x32xf32>
    %12 = arith.addf %9, %11 : vector<16x32xf32>
    %cst_11 = arith.constant 0.000000e+00 : f32
    %13 = vector.broadcast %cst_11 : f32 to vector<16x32xf32>
    %14 = arith.maximumf %12, %13 : vector<16x32xf32>
    %c0_12 = arith.constant 0 : index
    %c0_13 = arith.constant 0 : index
    %15 = vector.load %arg6[%c0_12, %c0_13] : memref<32x32xf32, #tpu.memory_space<vmem>>, vector<32x32xf32>
    %cst_14 = arith.constant dense<0.000000e+00> : vector<16x32xf32>
    %16 = tpu.matmul %14, %15, %cst_14 {dimension_numbers = #tpu.dot_dimension_numbers<[1], [0], [0], [1], [0, 0, 1, 1], [], []>} : vector<16x32xf32>, vector<32x32xf32>, vector<16x32xf32> -> vector<16x32xf32>
    %c0_15 = arith.constant 0 : index
    %c0_16 = arith.constant 0 : index
    %17 = vector.load %arg7[%c0_15, %c0_16] : memref<1x32xf32, #tpu.memory_space<vmem>>, vector<1x32xf32>
    %18 = vector.broadcast %17 : vector<1x32xf32> to vector<16x32xf32>
    %19 = arith.addf %16, %18 : vector<16x32xf32>
    %cst_17 = arith.constant 0.000000e+00 : f32
    %20 = vector.broadcast %cst_17 : f32 to vector<16x32xf32>
    %21 = arith.maximumf %19, %20 : vector<16x32xf32>
    %c0_18 = arith.constant 0 : index
    %c0_19 = arith.constant 0 : index
    %22 = vector.load %arg8[%c0_18, %c0_19] : memref<32x64xf32, #tpu.memory_space<vmem>>, vector<32x64xf32>
    %cst_20 = arith.constant dense<0.000000e+00> : vector<16x64xf32>
    %23 = tpu.matmul %21, %22, %cst_20 {dimension_numbers = #tpu.dot_dimension_numbers<[1], [0], [0], [1], [0, 0, 1, 1], [], []>} : vector<16x32xf32>, vector<32x64xf32>, vector<16x64xf32> -> vector<16x64xf32>
    %c0_21 = arith.constant 0 : index
    %c0_22 = arith.constant 0 : index
    %24 = vector.load %arg9[%c0_21, %c0_22] : memref<1x64xf32, #tpu.memory_space<vmem>>, vector<1x64xf32>
    %25 = vector.broadcast %24 : vector<1x64xf32> to vector<16x64xf32>
    %26 = arith.addf %23, %25 : vector<16x64xf32>
    %cst_23 = arith.constant 0.000000e+00 : f32
    %27 = vector.broadcast %cst_23 : f32 to vector<16x64xf32>
    %28 = arith.maximumf %26, %27 : vector<16x64xf32>
    %c0_24 = arith.constant 0 : index
    %c0_25 = arith.constant 0 : index
    %29 = vector.load %arg10[%c0_24, %c0_25] : memref<64x32xf32, #tpu.memory_space<vmem>>, vector<64x32xf32>
    %cst_26 = arith.constant dense<0.000000e+00> : vector<16x32xf32>
    %30 = tpu.matmul %28, %29, %cst_26 {dimension_numbers = #tpu.dot_dimension_numbers<[1], [0], [0], [1], [0, 0, 1, 1], [], []>} : vector<16x64xf32>, vector<64x32xf32>, vector<16x32xf32> -> vector<16x32xf32>
    %c0_27 = arith.constant 0 : index
    %c0_28 = arith.constant 0 : index
    %31 = vector.load %arg11[%c0_27, %c0_28] : memref<1x32xf32, #tpu.memory_space<vmem>>, vector<1x32xf32>
    %32 = vector.broadcast %31 : vector<1x32xf32> to vector<16x32xf32>
    %33 = arith.addf %30, %32 : vector<16x32xf32>
    %c0_29 = arith.constant 0 : index
    %c0_30 = arith.constant 0 : index
    %34 = vector.load %arg12[%c0_29, %c0_30] : memref<16x32xf32, #tpu.memory_space<vmem>>, vector<16x32xf32>
    tpu.vector_store %arg12[%c0_29, %c0_30], %33 {strides = array<i32>} : memref<16x32xf32, #tpu.memory_space<vmem>>, vector<16x32xf32>,
    return
  }
  func.func @transform_0(%arg0: i32) -> (i32, i32) {
    %c0_i32 = arith.constant 0 : i32
    %c0_i32_0 = arith.constant 0 : i32
    return %arg0, %c0_i32 : i32, i32
  }
  func.func @transform_1(%arg0: i32) -> (i32, i32) {
    %c0_i32 = arith.constant 0 : i32
    %c0_i32_0 = arith.constant 0 : i32
    %c0_i32_1 = arith.constant 0 : i32
    return %c0_i32, %c0_i32_0 : i32, i32
  }
  func.func @transform_2(%arg0: i32) -> (i32, i32) {
    %c0_i32 = arith.constant 0 : i32
    %c0_i32_0 = arith.constant 0 : i32
    %c0_i32_1 = arith.constant 0 : i32
    return %c0_i32, %c0_i32_0 : i32, i32
  }
  func.func @transform_3(%arg0: i32) -> (i32, i32) {
    %c0_i32 = arith.constant 0 : i32
    %c0_i32_0 = arith.constant 0 : i32
    %c0_i32_1 = arith.constant 0 : i32
    return %c0_i32, %c0_i32_0 : i32, i32
  }
  func.func @transform_4(%arg0: i32) -> (i32, i32) {
    %c0_i32 = arith.constant 0 : i32
    %c0_i32_0 = arith.constant 0 : i32
    %c0_i32_1 = arith.constant 0 : i32
    return %c0_i32, %c0_i32_0 : i32, i32
  }
  func.func @transform_5(%arg0: i32) -> (i32, i32) {
    %c0_i32 = arith.constant 0 : i32
    %c0_i32_0 = arith.constant 0 : i32
    %c0_i32_1 = arith.constant 0 : i32
    return %c0_i32, %c0_i32_0 : i32, i32
  }
  func.func @transform_6(%arg0: i32) -> (i32, i32) {
    %c0_i32 = arith.constant 0 : i32
    %c0_i32_0 = arith.constant 0 : i32
    %c0_i32_1 = arith.constant 0 : i32
    return %c0_i32, %c0_i32_0 : i32, i32
  }
  func.func @transform_7(%arg0: i32) -> (i32, i32) {
    %c0_i32 = arith.constant 0 : i32
    %c0_i32_0 = arith.constant 0 : i32
    %c0_i32_1 = arith.constant 0 : i32
    return %c0_i32, %c0_i32_0 : i32, i32
  }
  func.func @transform_8(%arg0: i32) -> (i32, i32) {
    %c0_i32 = arith.constant 0 : i32
    %c0_i32_0 = arith.constant 0 : i32
    %c0_i32_1 = arith.constant 0 : i32
    return %c0_i32, %c0_i32_0 : i32, i32
  }
  func.func @transform_9(%arg0: i32) -> (i32, i32) {
    %c0_i32 = arith.constant 0 : i32
    %c0_i32_0 = arith.constant 0 : i32
    %c0_i32_1 = arith.constant 0 : i32
    return %c0_i32, %c0_i32_0 : i32, i32
  }
  func.func @transform_10(%arg0: i32) -> (i32, i32) {
    %c0_i32 = arith.constant 0 : i32
    %c0_i32_0 = arith.constant 0 : i32
    %c0_i32_1 = arith.constant 0 : i32
    return %c0_i32, %c0_i32_0 : i32, i32
  }
  func.func @transform_11(%arg0: i32) -> (i32, i32) {
    %c0_i32 = arith.constant 0 : i32
    %c0_i32_0 = arith.constant 0 : i32
    return %arg0, %c0_i32 : i32, i32
  }
}

</mosaic_0001>

<bundles_post_ra>
// kernel: tpu_custom_call.1
= control target key start
LH: loop header
LB: loop body
LE: loop exit
PB: predicated region body
PF: predicated region fallthrough
CT: control target
= control target key end

     0   :  { %vm49_vm0 = vcmask 261120   ;;  %s499_s0 = inlined_call_operand.vmem [shape: f32[16,32], index: 0, kind: input, shape index: {}]   ;;  %s500_s1 = inlined_call_operand.vmem [shape: f32[32,64], index: 1, kind: input, shape index: {}]   ;;  %s501_s2 = inlined_call_operand.vmem [shape: f32[1,64], index: 2, kind: input, shape index: {}]   ;;  %s502_s3 = inlined_call_operand.vmem [shape: f32[64,32], index: 3, kind: input, shape index: {}]   ;;  %s503_s4 = inlined_call_operand.vmem [shape: f32[1,32], index: 4, kind: input, shape index: {}]   ;;  %s504_s5 = inlined_call_operand.vmem [shape: f32[32,32], index: 5, kind: input, shape index: {}]   ;;  %s505_s6 = inlined_call_operand.vmem [shape: f32[1,32], index: 6, kind: input, shape index: {}]   ;;  %s506_s7 = inlined_call_operand.vmem [shape: f32[32,64], index: 7, kind: input, shape index: {}]   ;;  %s507_s8 = inlined_call_operand.vmem [shape: f32[1,64], index: 8, kind: input, shape index: {}]   ;;  %s508_s9 = inlined_call_operand.vmem [shape: f32[64,32], index: 9, kind: input, shape index: {}]   ;;  %s509_s10 = inlined_call_operand.vmem [shape: f32[1,32], index: 10, kind: input, shape index: {}]   ;;  %s510_s11 = inlined_call_operand.hbm [shape: f32[16,32], index: 11, kind: output, shape index: {}]  }
   0x1   :  { %v44_v0 = vld [vmem:[%s500_s1 + $0x18] sm:$0xff]  ;;  %v43_v1 = vld [vmem:[%s500_s1 + $0x10] sm:$0xff]  ;;  %v42_v2 = vld [vmem:[%s500_s1 + $0x8] sm:$0xff] }
   0x2   :  { %68 = vmatpush.msra.mxu0 %v44_v0  ;;  %v88_v3 = vld [vmem:[%s502_s3 + $0x38] sm:$0xff]  ;;  %v87_v4 = vld [vmem:[%s502_s3 + $0x30] sm:$0xff]  ;;  %v41_v5 = vld [vmem:[%s500_s1] sm:$0xff] }
   0x3   :  { %v39_v6 = vld [vmem:[%s499_s0] sm:$0xff]  ;;  %108 = vmatpush.msra.mxu1 %v88_v3  ;;  %v86_v7 = vld [vmem:[%s502_s3 + $0x28] sm:$0xff] }
   0x4   :  { %69 = vmatpush.msra.mxu0 %v43_v1 }
   0x5   :  { %109 = vmatpush.msra.mxu1 %v87_v4 }
   0x6   :  { %70 = vmatpush.msra.mxu0 %v42_v2 }
   0x7   :  { %16 = vsyncpa [#allocation3], 0  ;;  %v85_v8 = vld [vmem:[%s502_s3 + $0x20] sm:$0xff]  ;;  %110 = vmatpush.msra.mxu1 %v86_v7  ;;  %v84_v9 = vld [vmem:[%s502_s3 + $0x18] sm:$0xff]  ;;  %vm93_vm1 = vcmask 523264   ;;  %s252_s18 = sshll.u32 %s510_s11, 4  ;;  %s253_s18 = int_to_ptr.hbm [resolvable:$true] %s252_s18 }
   0x8   :  { %71 = vmatpush.msra.mxu0 %v41_v5  ;;  %v40_v10 = vld [vmem:[%s499_s0 + $0x8] sm:$0xff]  ;;  %v83_v11 = vld [vmem:[%s502_s3 + $0x10] sm:$0xff]  ;;  %v81_v13 = vld [vmem:[%s502_s3] sm:$0xff]  ;;  %s318_s19 = smov 8  }
   0x9   :  { %264 = vmatmul.msk.f32.vlgmr.msra.gmra.mxu0 %vm49_vm0, %v39_v6  ;;  %111 = vmatpush.msra.mxu1 %v85_v8  ;;  %v82_v12 = vld [vmem:[%s502_s3 + $0x8] sm:$0xff]  ;;  %v128_v14 = vld [vmem:[%s504_s5 + $0x18] sm:$0xff]  ;;  %v285_v15 = vld [vmem:[%s501_s2] ss:$0 sm:$0xff] }
   0xa   :  { %151 = vmatpush.msra.mxu2 %v128_v14  ;;  %v127_v22 = vld [vmem:[%s504_s5 + $0x10] sm:$0xff]  ;;  %v126_v23 = vld [vmem:[%s504_s5 + $0x8] sm:$0xff]  ;;  %v125_v24 = vld [vmem:[%s504_s5] sm:$0xff] }
   0xb   :  { %112 = vmatpush.msra.mxu1 %v84_v9  ;;  %v167_v25 = vld [vmem:[%s506_s7 + $0x18] sm:$0xff]  ;;  %v286_v26 = vld [vmem:[%s503_s4] ss:$0 sm:$0xff]  ;;  %v166_v33 = vld [vmem:[%s506_s7 + $0x10] sm:$0xff]  ;;  %s317_s4 = smov 128  }
   0xc   :  { %152 = vmatpush.msra.mxu2 %v127_v22  ;;  %190 = vmatpush.msra.mxu3 %v167_v25  ;;  %v165_v34 = vld [vmem:[%s506_s7 + $0x8] sm:$0xff]  ;;  %v164_v35 = vld [vmem:[%s506_s7] sm:$0xff]  ;;  %v210_v36 = vld [vmem:[%s508_s9 + $0x38] sm:$0xff] }
   0xd   :  { %113 = vmatpush.msra.mxu1 %v83_v11  ;;  %v209_v37 = vld [vmem:[%s508_s9 + $0x30] sm:$0xff]  ;;  %229 = vmatpush.msrb.mxu0 %v210_v36  ;;  %v208_v38 = vld [vmem:[%s508_s9 + $0x28] sm:$0xff]  ;;  %v207_v39 = vld [vmem:[%s508_s9 + $0x20] sm:$0xff] }
   0xe   :  { %153 = vmatpush.msra.mxu2 %v126_v23  ;;  %191 = vmatpush.msra.mxu3 %v166_v33  ;;  %v206_v40 = vld [vmem:[%s508_s9 + $0x18] sm:$0xff]  ;;  %v287_v41 = vld [vmem:[%s505_s6] ss:$0 sm:$0xff]  ;;  %v205_v48 = vld [vmem:[%s508_s9 + $0x10] sm:$0xff] }
   0xf   :  { %114 = vmatpush.msra.mxu1 %v82_v12  ;;  %230 = vmatpush.msrb.mxu0 %v209_v37  ;;  %v204_v49 = vld [vmem:[%s508_s9 + $0x8] sm:$0xff]  ;;  %v203_v50 = vld [vmem:[%s508_s9] sm:$0xff]  ;;  %s316_s9 = smov [#allocation2]  }
  0x10   :  { %154 = vmatpush.msra.mxu2 %v125_v24  ;;  %192 = vmatpush.msra.mxu3 %v165_v34  ;;  %v288_v51 = vld [vmem:[%s507_s8] ss:$0 sm:$0xff]  ;;  %s250_s8 = sshll.u32 %s316_s9, 4  ;;  %s251_s8 = int_to_ptr.vmem [resolvable:$true] %s250_s8 }
  0x11   :  { %265 = vmatmul.msk.f32.gmra.mxu0 %vm49_vm0, %v40_v10  ;;  %115 = vmatpush.msra.mxu1 %v81_v13  ;;  %v289_v58 = vld [vmem:[%s509_s10] ss:$0 sm:$0xff] }
  0x12   :  { %193 = vmatpush.msra.mxu3 %v164_v35  ;;  %274 = vmatpush.msrb.mxu2 %v210_v36 }
  0x13   :  { %231 = vmatpush.msrb.mxu0 %v208_v38 }
  0x14   :  { %275 = vmatpush.msrb.mxu2 %v209_v37 }
  0x15   :  { %232 = vmatpush.msrb.mxu0 %v207_v39 }
  0x16   :  { %276 = vmatpush.msrb.mxu2 %v208_v38 }
  0x17   :  { %233 = vmatpush.msrb.mxu0 %v206_v40 }
  0x18   :  { %277 = vmatpush.msrb.mxu2 %v207_v39 }
  0x19   :  { %234 = vmatpush.msrb.mxu0 %v205_v48 }
  0x1a   :  { %278 = vmatpush.msrb.mxu2 %v206_v40 }
  0x1b   :  { %235 = vmatpush.msrb.mxu0 %v204_v49 }
  0x1c   :  { %279 = vmatpush.msrb.mxu2 %v205_v48 }
  0x1d   :  { %236 = vmatpush.msrb.mxu0 %v203_v50 }
  0x1e   :  { %280 = vmatpush.msrb.mxu2 %v204_v49 }
  0x20   :  { %281 = vmatpush.msrb.mxu2 %v203_v50 }
  0x86   :  { %v73_v16 = vpop.f32.mrf.mxu0 }
  0x87   :  { %v74_v17 = vadd.f32 %v285_v15, %v73_v16 }
  0x89   :  { %v79_v18 = vmax.f32 %v74_v17, 0.0 }
  0x8b   :  { %266 = vmatmul.msk.f32.vlgmr.msra.gmra.mxu1 %vm93_vm1, %v79_v18 }
  0x8e   :  { %v76_v19 = vpop.f32.mrf.mxu0 }
  0x8f   :  { %v77_v20 = vadd.f32 %v285_v15, %v76_v19 }
  0x91   :  { %v80_v21 = vmax.f32 %v77_v20, 0.0 }
  0x93   :  { %267 = vmatmul.msk.f32.gmra.mxu1 %vm93_vm1, %v80_v21 }
 0x108   :  { %v117_v27 = vpop.f32.mrf.mxu1 }
 0x109   :  { %v118_v28 = vadd.f32 %v286_v26, %v117_v27 }
 0x10b   :  { %v123_v29 = vmax.f32 %v118_v28, 0.0 }
 0x10d   :  { %268 = vmatmul.msk.f32.vlgmr.msra.gmra.mxu2 %vm49_vm0, %v123_v29 }
 0x110   :  { %v120_v30 = vpop.f32.mrf.mxu1 }
 0x111   :  { %v121_v31 = vadd.f32 %v286_v26, %v120_v30 }
 0x113   :  { %v124_v32 = vmax.f32 %v121_v31, 0.0 }
 0x115   :  { %269 = vmatmul.msk.f32.gmra.mxu2 %vm49_vm0, %v124_v32 }
 0x190   :  { %v156_v42 = vpop.f32.mrf.mxu2 }
 0x191   :  { %v157_v43 = vadd.f32 %v287_v41, %v156_v42 }
 0x193   :  { %v162_v44 = vmax.f32 %v157_v43, 0.0 }
 0x195   :  { %270 = vmatmul.msk.f32.vlgmr.msra.gmra.mxu3 %vm49_vm0, %v162_v44 }
 0x198   :  { %v159_v45 = vpop.f32.mrf.mxu2 }
 0x199   :  { %v160_v46 = vadd.f32 %v287_v41, %v159_v45 }
 0x19b   :  { %v163_v47 = vmax.f32 %v160_v46, 0.0 }
 0x19d   :  { %271 = vmatmul.msk.f32.gmra.mxu3 %vm49_vm0, %v163_v47 }
 0x218   :  { %v195_v52 = vpop.f32.mrf.mxu3 }
 0x219   :  { %v196_v53 = vadd.f32 %v288_v51, %v195_v52 }
 0x21b   :  { %v201_v54 = vmax.f32 %v196_v53, 0.0 }
 0x21d   :  { %272 = vmatmul.msk.f32.vlgmr.msrb.gmra.mxu0 %vm93_vm1, %v201_v54 }
 0x220   :  { %v198_v55 = vpop.f32.mrf.mxu3 }
 0x221   :  { %v199_v56 = vadd.f32 %v288_v51, %v198_v55 }
 0x223   :  { %v202_v57 = vmax.f32 %v199_v56, 0.0 }
 0x225   :  { %273 = vmatmul.msk.f32.vlgmr.msrb.gmra.mxu2 %vm93_vm1, %v202_v57 }
 0x29a   :  { %v238_v59 = vpop.f32.mrf.mxu0 }
 0x29b   :  { %v239_v60 = vadd.f32 %v289_v58, %v238_v59 }
 0x29d   :  { %244 = vst.msk [vmem:[#allocation2] sm:$0xff] %vm49_vm0, %v239_v60 }
 0x2a8   :  { %v241_v61 = vpop.f32.mrf.mxu2 }
 0x2a9   :  { %v242_v62 = vadd.f32 %v289_v58, %v241_v61 }
 0x2ab   :  { %245 = vst.msk [vmem:[#allocation2 + $0x8] sm:$0xff] %vm49_vm0, %v242_v62 }
 0x2ac   :  { %258 = dma.vmem_to_hbm [thread:$0]  %s251_s8, 256, %s253_s18, [#allocation3], %s317_s4, %s317_s4, %s318_s19  }
 0x2ad   :  { %314 = dma.done.wait [#allocation3], 256  }
 0x2ae   :  { %315 = vsyncadd [#allocation3], 4294967040 }
 0x2af   :  { %263 = vsyncpa [#allocation3], 1 }

</bundles_post_ra>
